<compile_context>
chip_gen: v5e
topology: v5e:2x2
jax: 0.10.0
libtpu: 0.0.40
codegen_flags: <defaults>
</compile_context>

<pallas_src>
import functools

import jax
import jax.numpy as jnp
from jax.experimental import pallas as pl
from jax.experimental.pallas import tpu as pltpu


def _round_up(n: int, m: int) -> int:
    return ((n + m - 1) // m) * m


# --------------------------------------------------------------------------
# Fused kernel:  out = Linear_L(... ReLU(Linear_1(drop_1(x))) ... drop_L(.))
# --------------------------------------------------------------------------
def _make_fused_mlp_kernel(n_layers: int, train: bool):
    """kernel(x, [mask_0..mask_{L-1} if train], w_0, b_0, ..., w_{L-1}, b_{L-1}, out)."""

    def kernel(*refs):
        idx = 0
        x_ref = refs[idx]; idx += 1
        if train:
            mask_refs = refs[idx:idx + n_layers]; idx += n_layers
        wb_refs = refs[idx:idx + 2 * n_layers]; idx += 2 * n_layers
        out_ref = refs[idx]

        h = x_ref[...]                                    # (TM, F0p) bf16
        for l in range(n_layers):
            if train:
                h = h * mask_refs[l][...]                 # pre-scaled inverted dropout
            h = h.astype(jnp.bfloat16)                    # bf16 operands -> MXU fast path
            y = jnp.dot(h, wb_refs[2 * l][...],
                        preferred_element_type=jnp.float32)
            y = y + wb_refs[2 * l + 1][...]               # (1, Fp) f32 bias broadcast
            if l != n_layers - 1:
                y = jnp.maximum(y, jnp.float32(0.0))      # ReLU on hidden layers only
            h = y
        out_ref[...] = h.astype(out_ref.dtype)

    return kernel


# --------------------------------------------------------------------------
# Parameter init (mimics nn.Linear default U(-1/sqrt(fan_in), +))
# --------------------------------------------------------------------------
def init_mlp_dropout_params(key, fc_sizes):
    sizes = list(fc_sizes)
    params = []
    for fan_in, fan_out in zip(sizes[:-1], sizes[1:]):
        key, kw, kb = jax.random.split(key, 3)
        bound = 1.0 / (fan_in ** 0.5)
        # stored transposed relative to torch: (fan_in, fan_out)
        w = jax.random.uniform(kw, (fan_in, fan_out), jnp.float32, -bound, bound)
        b = jax.random.uniform(kb, (fan_out,), jnp.float32, -bound, bound)
        params.append((w, b))
    return params


# --------------------------------------------------------------------------
# Forward wrapper
# --------------------------------------------------------------------------
@functools.partial(jax.jit, static_argnames=("p", "p_input", "train", "seed"))
def mlp_dropout_forward(x, params, *, p=0.5, p_input=0.25, train=True, seed=0):
    """Matches MLPDropout.forward: flatten, then [Dropout, Linear, ReLU]*, Dropout, Linear."""
    B = x.shape[0]
    h = x.reshape(B, -1)
    Fin = h.shape[1]
    n_layers = len(params)
    first_in = params[0][0].shape[0]
    assert Fin == first_in, "flattened features must match first layer fan_in"

    # ---- batch tiling --------------------------------------------------
    TM = 256                                  # default batch tile (rows)
    if B <= TM:
        TM = max(8, _round_up(B, 8))          # tiny batches: one tile, sublane-aligned
    Bp = _round_up(B, TM)
    grid = (Bp // TM,)

    # ---- pad + cast parameters (lane-dense, bf16 weights, f32 bias) ----
    wbs = []
    in_widths = []                            # padded fan_in per layer (mask widths)
    for w, b in params:
        fin, fout = w.shape
        finp, foutp = _round_up(fin, 128), _round_up(fout, 128)
        wp = jnp.pad(w, ((0, finp - fin), (0, foutp - fout))).astype(jnp.bfloat16)
        bp = jnp.pad(b, (0, foutp - fout)).astype(jnp.float32).reshape(1, foutp)
        wbs.append((wp, bp))
        in_widths.append(finp)

    F0p = in_widths[0]
    FLp = wbs[-1][0].shape[1]

    # ---- pad + cast activations ---------------------------------------
    xp = jnp.pad(h.astype(jnp.bfloat16), ((0, Bp - B), (0, F0p - Fin)))

    # ---- dropout masks (host-side jax.random, pre-scaled 1/(1-p)) ------
    mask_args = []
    if train:
        key = jax.random.PRNGKey(seed)
        for i, (w, _) in enumerate(params):
            fan_in = w.shape[0]
            # faithful to torch: final layer always uses p; hidden layers use
            # p_input iff their fan_in equals the input size.
            drop_p = p if i == n_layers - 1 else (p_input if fan_in == first_in else p)
            key, sub = jax.random.split(key)
            width = in_widths[i]
            if drop_p > 0.0:
                keep = jax.random.bernoulli(sub, 1.0 - drop_p, (Bp, width))
                m = (keep.astype(jnp.float32) * (1.0 / (1.0 - drop_p))).astype(jnp.bfloat16)
            else:
                m = jnp.ones((Bp, width), jnp.bfloat16)
            mask_args.append(m)

    # ---- BlockSpecs -----------------------------------------------------
    in_specs = [pl.BlockSpec((TM, F0p), lambda i: (i, 0))]      # x: batch-tiled
    args = [xp]
    if train:
        for m in mask_args:                                      # masks: batch-tiled
            in_specs.append(pl.BlockSpec((TM, m.shape[1]), lambda i: (i, 0)))
            args.append(m)
    for wp, bp in wbs:                                           # weights/bias: resident
        in_specs.append(pl.BlockSpec(wp.shape, lambda i: (0, 0)))
        in_specs.append(pl.BlockSpec(bp.shape, lambda i: (0, 0)))
        args.extend([wp, bp])

    out_spec = pl.BlockSpec((TM, FLp), lambda i: (i, 0))

    kernel = _make_fused_mlp_kernel(n_layers, bool(train))
    out_padded = pl.pallas_call(
        kernel,
        out_shape=jax.ShapeDtypeStruct((Bp, FLp), jnp.float32),
        grid=grid,
        in_specs=in_specs,
        out_specs=out_spec,
        compiler_params=pltpu.CompilerParams(
            dimension_semantics=("parallel",)),   # megacore/v7x: shard batch tiles
    )(*args)

    n_classes = params[-1][0].shape[1]
    return out_padded[:B, :n_classes]


# --------------------------------------------------------------------------
# Pure-JAX eval-mode reference (same bf16 matmul precision as the kernel)
# --------------------------------------------------------------------------
def _reference_forward_eval(x, params):
    B = x.shape[0]
    h = x.reshape(B, -1).astype(jnp.bfloat16)
    n_layers = len(params)
    y = None
    for i, (w, b) in enumerate(params):
        y = jnp.dot(h, w.astype(jnp.bfloat16),
                    preferred_element_type=jnp.float32) + b.astype(jnp.float32)
        if i != n_layers - 1:
            y = jnp.maximum(y, 0.0)
        h = y.astype(jnp.bfloat16)
    return y


if __name__ == "__main__":
    key = jax.random.PRNGKey(0)
    kx, kp = jax.random.split(key)

    # MLPDropout(64, 32, 16, 8): 64 input features, two hidden layers, 8 classes.
    fc_sizes = (64, 32, 16, 8)
    x = jax.random.normal(kx, (2, 4, 4, 4), dtype=jnp.float32)   # flattens to (2, 64)
    params = init_mlp_dropout_params(kp, fc_sizes)

    # Training-mode forward (fused dropout masks, deterministic seed).
    out_train = mlp_dropout_forward(x, params, p=0.5, p_input=0.25,
                                    train=True, seed=0)
    jax.block_until_ready(out_train)
    assert out_train.shape == (2, fc_sizes[-1])
    assert bool(jnp.isfinite(out_train).all())

    # Eval-mode forward must match the pure-JAX reference (dropout off).
    out_eval = mlp_dropout_forward(x, params, p=0.5, p_input=0.25,
                                   train=False, seed=0)
    jax.block_until_ready(out_eval)
    ref = _reference_forward_eval(x, params)
    assert out_eval.shape == ref.shape
    assert jnp.allclose(out_eval, ref, atol=1e-2, rtol=1e-2), "eval-mode mismatch"

    print("KERNEL_OK")
</pallas_src>

<mosaic_0001>
module attributes {stable_mosaic.version = 11 : i64} {
  func.func @kernel(%arg0: i32, %arg1: memref<8x128xbf16, #tpu.memory_space<vmem>>, %arg2: memref<8x128xbf16, #tpu.memory_space<vmem>>, %arg3: memref<8x128xbf16, #tpu.memory_space<vmem>>, %arg4: memref<8x128xbf16, #tpu.memory_space<vmem>>, %arg5: memref<128x128xbf16, #tpu.memory_space<vmem>>, %arg6: memref<1x128xf32, #tpu.memory_space<vmem>>, %arg7: memref<128x128xbf16, #tpu.memory_space<vmem>>, %arg8: memref<1x128xf32, #tpu.memory_space<vmem>>, %arg9: memref<128x128xbf16, #tpu.memory_space<vmem>>, %arg10: memref<1x128xf32, #tpu.memory_space<vmem>>, %arg11: memref<8x128xf32, #tpu.memory_space<vmem>>) attributes {dimension_semantics = [#tpu.dimension_semantics<parallel>], iteration_bounds = array<i64: 1>, scalar_prefetch = 0 : i64, scratch_operands = 0 : i64, tpu.core_type = #tpu.core_type<tc>, window_params = [{transform_indices = @transform_0, window_bounds = array<i64: 8, 128>}, {transform_indices = @transform_1, window_bounds = array<i64: 8, 128>}, {transform_indices = @transform_2, window_bounds = array<i64: 8, 128>}, {transform_indices = @transform_3, window_bounds = array<i64: 8, 128>}, {pipeline_mode = #tpu.pipeline_mode<synchronous>, transform_indices = @transform_4, window_bounds = array<i64: 128, 128>}, {pipeline_mode = #tpu.pipeline_mode<synchronous>, transform_indices = @transform_5, window_bounds = array<i64: 1, 128>}, {pipeline_mode = #tpu.pipeline_mode<synchronous>, transform_indices = @transform_6, window_bounds = array<i64: 128, 128>}, {pipeline_mode = #tpu.pipeline_mode<synchronous>, transform_indices = @transform_7, window_bounds = array<i64: 1, 128>}, {pipeline_mode = #tpu.pipeline_mode<synchronous>, transform_indices = @transform_8, window_bounds = array<i64: 128, 128>}, {pipeline_mode = #tpu.pipeline_mode<synchronous>, transform_indices = @transform_9, window_bounds = array<i64: 1, 128>}, {transform_indices = @transform_10, window_bounds = array<i64: 8, 128>}]} {
    %c0 = arith.constant 0 : index
    %c0_0 = arith.constant 0 : index
    %0 = vector.load %arg1[%c0, %c0_0] : memref<8x128xbf16, #tpu.memory_space<vmem>>, vector<8x128xbf16>
    %c0_1 = arith.constant 0 : index
    %c0_2 = arith.constant 0 : index
    %1 = vector.load %arg2[%c0_1, %c0_2] : memref<8x128xbf16, #tpu.memory_space<vmem>>, vector<8x128xbf16>
    %2 = arith.mulf %0, %1 : vector<8x128xbf16>
    %c0_3 = arith.constant 0 : index
    %c0_4 = arith.constant 0 : index
    %3 = vector.load %arg5[%c0_3, %c0_4] : memref<128x128xbf16, #tpu.memory_space<vmem>>, vector<128x128xbf16>
    %cst = arith.constant dense<0.000000e+00> : vector<8x128xf32>
    %4 = tpu.matmul %2, %3, %cst {dimension_numbers = #tpu.dot_dimension_numbers<[1], [0], [0], [1], [0, 0, 1, 1], [], []>} : vector<8x128xbf16>, vector<128x128xbf16>, vector<8x128xf32> -> vector<8x128xf32>
    %c0_5 = arith.constant 0 : index
    %c0_6 = arith.constant 0 : index
    %5 = vector.load %arg6[%c0_5, %c0_6] : memref<1x128xf32, #tpu.memory_space<vmem>>, vector<1x128xf32>
    %6 = vector.broadcast %5 : vector<1x128xf32> to vector<8x128xf32>
    %7 = arith.addf %4, %6 : vector<8x128xf32>
    %cst_7 = arith.constant 0.000000e+00 : f32
    %8 = vector.broadcast %cst_7 : f32 to vector<8x128xf32>
    %9 = arith.maximumf %7, %8 : vector<8x128xf32>
    %c0_8 = arith.constant 0 : index
    %c0_9 = arith.constant 0 : index
    %10 = vector.load %arg3[%c0_8, %c0_9] : memref<8x128xbf16, #tpu.memory_space<vmem>>, vector<8x128xbf16>
    %11 = arith.extf %10 : vector<8x128xbf16> to vector<8x128xf32>
    %12 = arith.mulf %9, %11 : vector<8x128xf32>
    %13 = arith.truncf %12 : vector<8x128xf32> to vector<8x128xbf16>
    %c0_10 = arith.constant 0 : index
    %c0_11 = arith.constant 0 : index
    %14 = vector.load %arg7[%c0_10, %c0_11] : memref<128x128xbf16, #tpu.memory_space<vmem>>, vector<128x128xbf16>
    %cst_12 = arith.constant dense<0.000000e+00> : vector<8x128xf32>
    %15 = tpu.matmul %13, %14, %cst_12 {dimension_numbers = #tpu.dot_dimension_numbers<[1], [0], [0], [1], [0, 0, 1, 1], [], []>} : vector<8x128xbf16>, vector<128x128xbf16>, vector<8x128xf32> -> vector<8x128xf32>
    %c0_13 = arith.constant 0 : index
    %c0_14 = arith.constant 0 : index
    %16 = vector.load %arg8[%c0_13, %c0_14] : memref<1x128xf32, #tpu.memory_space<vmem>>, vector<1x128xf32>
    %17 = vector.broadcast %16 : vector<1x128xf32> to vector<8x128xf32>
    %18 = arith.addf %15, %17 : vector<8x128xf32>
    %cst_15 = arith.constant 0.000000e+00 : f32
    %19 = vector.broadcast %cst_15 : f32 to vector<8x128xf32>
    %20 = arith.maximumf %18, %19 : vector<8x128xf32>
    %c0_16 = arith.constant 0 : index
    %c0_17 = arith.constant 0 : index
    %21 = vector.load %arg4[%c0_16, %c0_17] : memref<8x128xbf16, #tpu.memory_space<vmem>>, vector<8x128xbf16>
    %22 = arith.extf %21 : vector<8x128xbf16> to vector<8x128xf32>
    %23 = arith.mulf %20, %22 : vector<8x128xf32>
    %24 = arith.truncf %23 : vector<8x128xf32> to vector<8x128xbf16>
    %c0_18 = arith.constant 0 : index
    %c0_19 = arith.constant 0 : index
    %25 = vector.load %arg9[%c0_18, %c0_19] : memref<128x128xbf16, #tpu.memory_space<vmem>>, vector<128x128xbf16>
    %cst_20 = arith.constant dense<0.000000e+00> : vector<8x128xf32>
    %26 = tpu.matmul %24, %25, %cst_20 {dimension_numbers = #tpu.dot_dimension_numbers<[1], [0], [0], [1], [0, 0, 1, 1], [], []>} : vector<8x128xbf16>, vector<128x128xbf16>, vector<8x128xf32> -> vector<8x128xf32>
    %c0_21 = arith.constant 0 : index
    %c0_22 = arith.constant 0 : index
    %27 = vector.load %arg10[%c0_21, %c0_22] : memref<1x128xf32, #tpu.memory_space<vmem>>, vector<1x128xf32>
    %28 = vector.broadcast %27 : vector<1x128xf32> to vector<8x128xf32>
    %29 = arith.addf %26, %28 : vector<8x128xf32>
    %c0_23 = arith.constant 0 : index
    %c0_24 = arith.constant 0 : index
    %30 = vector.load %arg11[%c0_23, %c0_24] : memref<8x128xf32, #tpu.memory_space<vmem>>, vector<8x128xf32>
    tpu.vector_store %arg11[%c0_23, %c0_24], %29 {strides = array<i32>} : memref<8x128xf32, #tpu.memory_space<vmem>>, vector<8x128xf32>,
    return
  }
  func.func @transform_0(%arg0: i32) -> (i32, i32) {
    %c0_i32 = arith.constant 0 : i32
    %c0_i32_0 = arith.constant 0 : i32
    return %arg0, %c0_i32 : i32, i32
  }
  func.func @transform_1(%arg0: i32) -> (i32, i32) {
    %c0_i32 = arith.constant 0 : i32
    %c0_i32_0 = arith.constant 0 : i32
    return %arg0, %c0_i32 : i32, i32
  }
  func.func @transform_2(%arg0: i32) -> (i32, i32) {
    %c0_i32 = arith.constant 0 : i32
    %c0_i32_0 = arith.constant 0 : i32
    return %arg0, %c0_i32 : i32, i32
  }
  func.func @transform_3(%arg0: i32) -> (i32, i32) {
    %c0_i32 = arith.constant 0 : i32
    %c0_i32_0 = arith.constant 0 : i32
    return %arg0, %c0_i32 : i32, i32
  }
  func.func @transform_4(%arg0: i32) -> (i32, i32) {
    %c0_i32 = arith.constant 0 : i32
    %c0_i32_0 = arith.constant 0 : i32
    %c0_i32_1 = arith.constant 0 : i32
    return %c0_i32, %c0_i32_0 : i32, i32
  }
  func.func @transform_5(%arg0: i32) -> (i32, i32) {
    %c0_i32 = arith.constant 0 : i32
    %c0_i32_0 = arith.constant 0 : i32
    %c0_i32_1 = arith.constant 0 : i32
    return %c0_i32, %c0_i32_0 : i32, i32
  }
  func.func @transform_6(%arg0: i32) -> (i32, i32) {
    %c0_i32 = arith.constant 0 : i32
    %c0_i32_0 = arith.constant 0 : i32
    %c0_i32_1 = arith.constant 0 : i32
    return %c0_i32, %c0_i32_0 : i32, i32
  }
  func.func @transform_7(%arg0: i32) -> (i32, i32) {
    %c0_i32 = arith.constant 0 : i32
    %c0_i32_0 = arith.constant 0 : i32
    %c0_i32_1 = arith.constant 0 : i32
    return %c0_i32, %c0_i32_0 : i32, i32
  }
  func.func @transform_8(%arg0: i32) -> (i32, i32) {
    %c0_i32 = arith.constant 0 : i32
    %c0_i32_0 = arith.constant 0 : i32
    %c0_i32_1 = arith.constant 0 : i32
    return %c0_i32, %c0_i32_0 : i32, i32
  }
  func.func @transform_9(%arg0: i32) -> (i32, i32) {
    %c0_i32 = arith.constant 0 : i32
    %c0_i32_0 = arith.constant 0 : i32
    %c0_i32_1 = arith.constant 0 : i32
    return %c0_i32, %c0_i32_0 : i32, i32
  }
  func.func @transform_10(%arg0: i32) -> (i32, i32) {
    %c0_i32 = arith.constant 0 : i32
    %c0_i32_0 = arith.constant 0 : i32
    return %arg0, %c0_i32 : i32, i32
  }
}

</mosaic_0001>

<bundles_post_ra>
// kernel: mlp_dropout_forward.1
= control target key start
LH: loop header
LB: loop body
LE: loop exit
PB: predicated region body
PF: predicated region fallthrough
CT: control target
= control target key end

     0   :  { %s573_s4 = inlined_call_operand.vmem [shape: bf16[128,128], index: 4, kind: input, shape index: {}]   ;;  %s574_s6 = inlined_call_operand.vmem [shape: bf16[128,128], index: 6, kind: input, shape index: {}]   ;;  %s575_s5 = inlined_call_operand.vmem [shape: f32[1,128], index: 5, kind: input, shape index: {}]   ;;  %s576_s0 = inlined_call_operand.vmem [shape: bf16[8,128], index: 0, kind: input, shape index: {}]   ;;  %s577_s1 = inlined_call_operand.vmem [shape: bf16[8,128], index: 1, kind: input, shape index: {}]   ;;  %s578_s7 = inlined_call_operand.vmem [shape: f32[1,128], index: 7, kind: input, shape index: {}]   ;;  %s579_s8 = inlined_call_operand.vmem [shape: bf16[128,128], index: 8, kind: input, shape index: {}]   ;;  %s580_s2 = inlined_call_operand.vmem [shape: bf16[8,128], index: 2, kind: input, shape index: {}]   ;;  %s581_s9 = inlined_call_operand.vmem [shape: f32[1,128], index: 9, kind: input, shape index: {}]   ;;  %s582_s3 = inlined_call_operand.vmem [shape: bf16[8,128], index: 3, kind: input, shape index: {}]   ;;  %s583_s10 = inlined_call_operand.vmem [shape: f32[8,128], index: 10, kind: output, shape index: {}]  }
   0x1   :  { %v402_v0 = vld [vmem:[%s573_s4 + $0x38] sm:$0xff]  ;;  %v401_v1 = vld [vmem:[%s573_s4 + $0x30] sm:$0xff]  ;;  %v400_v4 = vld [vmem:[%s573_s4 + $0x28] sm:$0xff] }
   0x2   :  { %109 = vmatpush.bf16.msra.mxu0 %v402_v0  ;;  %v410_v2 = vld [vmem:[%s574_s6 + $0x38] sm:$0xff]  ;;  %v409_v3 = vld [vmem:[%s574_s6 + $0x30] sm:$0xff]  ;;  %v408_v5 = vld [vmem:[%s574_s6 + $0x28] sm:$0xff] }
   0x3   :  { %195 = vmatpush.bf16.msra.mxu1 %v410_v2  ;;  %v399_v6 = vld [vmem:[%s573_s4 + $0x20] sm:$0xff]  ;;  %v398_v8 = vld [vmem:[%s573_s4 + $0x18] sm:$0xff]  ;;  %v397_v10 = vld [vmem:[%s573_s4 + $0x10] sm:$0xff] }
   0x4   :  { %v407_v7 = vld [vmem:[%s574_s6 + $0x20] sm:$0xff]  ;;  %v406_v9 = vld [vmem:[%s574_s6 + $0x18] sm:$0xff]  ;;  %v405_v15 = vld [vmem:[%s574_s6 + $0x10] sm:$0xff] }
   0x5   :  { %v35_v11 = vld [vmem:[%s576_s0] sm:$0xf]  ;;  %v396_v16 = vld [vmem:[%s573_s4 + $0x8] sm:$0xff]  ;;  %v418_v22 = vld [vmem:[%s579_s8 + $0x38] sm:$0xff] }
   0x6   :  { %110 = vmatpush.bf16.msra.mxu0 %v401_v1  ;;  %v36_v12 = vld [vmem:[%s577_s1] sm:$0xf]  ;;  %v37_v13 = vunpack.c.l.bf16 %v35_v11  ;;  %v404_v20 = vld [vmem:[%s574_s6 + $0x8] sm:$0xff]  ;;  %281 = vmatpush.bf16.msra.mxu2 %v418_v22  ;;  %v417_v23 = vld [vmem:[%s579_s8 + $0x30] sm:$0xff] }
   0x7   :  { %196 = vmatpush.bf16.msra.mxu1 %v409_v3  ;;  %v38_v14 = vunpack.c.l.bf16 %v36_v12  ;;  %v395_v18 = vld [vmem:[%s573_s4] sm:$0xff]  ;;  %v416_v24 = vld [vmem:[%s579_s8 + $0x28] sm:$0xff]  ;;  %v414_v26 = vld [vmem:[%s579_s8 + $0x18] sm:$0xff] }
   0x8   :  { %v403_v21 = vld [vmem:[%s574_s6] sm:$0xff]  ;;  %v413_v27 = vld [vmem:[%s579_s8 + $0x10] sm:$0xff]  ;;  %v412_v37 = vld [vmem:[%s579_s8 + $0x8] sm:$0xff] }
   0x9   :  { %v39_v17 = vmul.f32 %v38_v14, %v37_v13  ;;  %v415_v25 = vld [vmem:[%s579_s8 + $0x20] sm:$0xff] }
   0xa   :  { %111 = vmatpush.bf16.msra.mxu0 %v400_v4  ;;  %282 = vmatpush.bf16.msra.mxu2 %v417_v23  ;;  %v419_v28 = vld [vmem:[%s575_s5] ss:$0 sm:$0xff] }
   0xb   :  { %197 = vmatpush.bf16.msra.mxu1 %v408_v5  ;;  %v40_v19 = vpack.c.bf16 %v39_v17, %v39_v17  ;;  %v123_v29 = vld [vmem:[%s580_s2] sm:$0xf] }
   0xc   :  { %v124_v32 = vunpack.c.l.bf16 %v123_v29  ;;  %v411_v38 = vld [vmem:[%s579_s8] sm:$0xff] }
   0xd   :  { %v420_v39 = vld [vmem:[%s578_s7] ss:$0 sm:$0xff] }
   0xe   :  { %112 = vmatpush.bf16.msra.mxu0 %v399_v6  ;;  %283 = vmatpush.bf16.msra.mxu2 %v416_v24  ;;  %v209_v40 = vld [vmem:[%s582_s3] sm:$0xf] }
   0xf   :  { %198 = vmatpush.bf16.msra.mxu1 %v407_v7  ;;  %v210_v43 = vunpack.c.l.bf16 %v209_v40  ;;  %v421_v48 = vld [vmem:[%s581_s9] ss:$0 sm:$0xff] }
  0x12   :  { %113 = vmatpush.bf16.msra.mxu0 %v398_v8  ;;  %284 = vmatpush.bf16.msra.mxu2 %v415_v25 }
  0x13   :  { %199 = vmatpush.bf16.msra.mxu1 %v406_v9 }
  0x16   :  { %114 = vmatpush.bf16.msra.mxu0 %v397_v10  ;;  %285 = vmatpush.bf16.msra.mxu2 %v414_v26 }
  0x17   :  { %200 = vmatpush.bf16.msra.mxu1 %v405_v15 }
  0x1a   :  { %115 = vmatpush.bf16.msra.mxu0 %v396_v16  ;;  %286 = vmatpush.bf16.msra.mxu2 %v413_v27 }
  0x1b   :  { %201 = vmatpush.bf16.msra.mxu1 %v404_v20 }
  0x1e   :  { %116 = vmatpush.bf16.msra.mxu0 %v395_v18  ;;  %287 = vmatpush.bf16.msra.mxu2 %v412_v37 }
  0x1f   :  { %202 = vmatpush.bf16.msra.mxu1 %v403_v21 }
  0x21   :  { %117 = vmatmul.bf16.vlgmr.msra.gmra.mxu0 %v40_v19 }
  0x22   :  { %288 = vmatpush.bf16.msra.mxu2 %v411_v38 }
  0x9e   :  { %v118_v30 = vpop.f32.mrf.mxu0 }
  0x9f   :  { %v119_v31 = vadd.f32 %v419_v28, %v118_v30 }
  0xa1   :  { %v122_v33 = vmax.f32 %v119_v31, 0.0 }
  0xa3   :  { %v125_v34 = vmul.f32 %v124_v32, %v122_v33 }
  0xa5   :  { %v126_v35 = vpack.c.bf16 %v125_v34, %v125_v34 }
  0xa6   :  { %v120_v36 = vpop.f32.mrf.mxu0 }
  0xa7   :  { %203 = vmatmul.bf16.vlgmr.msra.gmra.mxu1 %v126_v35 }
 0x124   :  { %v204_v41 = vpop.f32.mrf.mxu1 }
 0x125   :  { %v205_v42 = vadd.f32 %v420_v39, %v204_v41 }
 0x127   :  { %v208_v44 = vmax.f32 %v205_v42, 0.0 }
 0x129   :  { %v211_v45 = vmul.f32 %v210_v43, %v208_v44 }
 0x12b   :  { %v212_v46 = vpack.c.bf16 %v211_v45, %v211_v45 }
 0x12c   :  { %v206_v47 = vpop.f32.mrf.mxu1 }
 0x12d   :  { %289 = vmatmul.bf16.vlgmr.msra.gmra.mxu2 %v212_v46 }
 0x1b0   :  { %v290_v49 = vpop.f32.mrf.mxu2 }
 0x1b1   :  { %v291_v50 = vadd.f32 %v421_v48, %v290_v49 }
 0x1b3   :  { %294 = vst [vmem:[%s583_s10] sm:$0xff] %v291_v50 }
 0x1b8   :  { %v292_v51 = vpop.f32.mrf.mxu2 }

</bundles_post_ra>
